<compile_context>
chip_gen: v7x
topology: tpu7x:2x2x1
jax: 0.10.0
libtpu: 0.0.40
codegen_flags: <defaults>
</compile_context>

<pallas_src>
import functools

import jax
import jax.numpy as jnp
import numpy as np
from jax.experimental import pallas as pl
from jax.experimental.pallas import tpu as pltpu

_MIB = 1024 * 1024
_DEFAULT_VMEM_CAP = 64 * _MIB  # v7x per-TensorCore (smallest across v5e/v6e/v7x)


def _vmem_capacity_bytes() -> int:
    """Physical VMEM per core; conservative default if the query fails."""
    try:
        info = pltpu.get_tpu_info()
        cap = int(getattr(info, "vmem_capacity_bytes", 0))
        if cap > 0:
            return cap
    except Exception:
        pass
    return _DEFAULT_VMEM_CAP


def _sublane_unit(dtype) -> int:
    """Packed-sublane tile height: 8 for f32, 16 for bf16, 32 for int8/fp8."""
    itemsize = jnp.dtype(dtype).itemsize
    return 8 * max(1, 4 // itemsize)


def _pick_row_tile(extent: int, unit: int, cap: int) -> int:
    """Largest divisor of `extent` <= cap that is legal as a second-minor block
    dim: prefer a multiple of the dtype sublane unit, else a multiple of 8,
    else the full extent (always legal)."""
    cap = max(1, min(cap, extent))
    best8 = None
    for d in range(cap, 0, -1):
        if extent % d:
            continue
        if d % unit == 0:
            return d
        if best8 is None and d % 8 == 0:
            best8 = d
    if best8 is not None:
        return best8
    return extent


def _largest_lane_tile(extent: int, cap: int) -> int:
    """Largest multiple-of-128 divisor of `extent` (itself a multiple of 128)
    that is <= cap (at least 128)."""
    cap = max(128, min(cap, extent))
    for d in range(cap - cap % 128, 0, -128):
        if extent % d == 0:
            return d
    return 128


def _vmem_limit(need_bytes: int, limit_cap: int):
    """Only raise the scoped-VMEM limit when the blocks actually need it."""
    if need_bytes + 2 * _MIB <= 16 * _MIB:  # default scoped limit is >= 16 MiB
        return None
    return int(min(need_bytes + 4 * _MIB, limit_cap))


# ---------------------------------------------------------------------------
# Kernels
# ---------------------------------------------------------------------------

def _mgp_rows_kernel(x_ref, o_ref, *, g: int, hw: int):
    """x_ref: (t_rows, g*hw) — groups are contiguous 128-aligned lane segments.
    o_ref: (t_rows, hw). Pure full-width, unmasked VPU maxima."""
    acc = x_ref[:, pl.ds(0, hw)]
    for j in range(1, g):
        acc = jnp.maximum(acc, x_ref[:, pl.ds(j * hw, hw)])
    o_ref[...] = acc


def _mgp_hw_tiled_kernel(x_ref, o_ref, *, g: int):
    """Fallback for huge rows. x_ref: (t_rows, g, t_hw); o_ref: (t_rows, t_hw)."""
    acc = x_ref[:, 0, :]
    for j in range(1, g):
        acc = jnp.maximum(acc, x_ref[:, j, :])
    o_ref[...] = acc


# ---------------------------------------------------------------------------
# Wrapper
# ---------------------------------------------------------------------------

def max_group_pooling(
    x: jax.Array,
    channel_per_group: int = 2,
    *,
    target_block_bytes: int | None = None,
    min_pallas_bytes: int = 1 * _MIB,
) -> jax.Array:
    """Pallas implementation of MaxGroupPooling.forward for NCHW input."""
    g = int(channel_per_group)
    if g == 1:
        return x

    b, c, h, w = x.shape
    assert c % g == 0, "channels must be divisible by channel_per_group"
    cpg = c // g
    hw = h * w
    itemsize = jnp.dtype(x.dtype).itemsize

    # Tiny tensors: a standalone Pallas call is pure launch/DMA overhead; let
    # XLA fuse the reshape+max into the surrounding graph instead.
    if x.size * itemsize < min_pallas_bytes:
        return jnp.max(x.reshape(b, cpg, g, h, w), axis=2)

    R = b * cpg
    hw_p = -(-hw // 128) * 128  # lane-align the pixel axis

    x3 = x.reshape(R, g, hw)
    if hw_p != hw:
        # Padded columns only affect padded output columns (sliced off later),
        # so the pad value is irrelevant for correctness.
        x3 = jnp.pad(x3, ((0, 0), (0, 0), (0, hw_p - hw)))

    vmem_cap = _vmem_capacity_bytes()
    budget = int(vmem_cap * 0.7)      # for double-buffered in + out blocks
    limit_cap = int(vmem_cap * 0.9)
    if target_block_bytes is None:
        target_block_bytes = min(16 * _MIB, max(_MIB, budget // 3))

    unit = _sublane_unit(x.dtype)
    row_bytes = g * hw_p * itemsize   # one row of the lane-contiguous layout

    # ----- main path: (R, g*hw_p), tile rows only --------------------------
    t_rows = _pick_row_tile(R, unit, max(1, target_block_bytes // row_bytes))
    in_blk = t_rows * row_bytes
    out_blk = t_rows * hw_p * itemsize
    need = 2 * (in_blk + out_blk)

    use_main = (row_bytes <= target_block_bytes) and (need <= budget)

    if use_main:
        # Give the v7x megacore at least 2 parallel grid steps when the tensor
        # is big enough for the extra step overhead to be irrelevant.
        if R // t_rows == 1 and in_blk >= _MIB:
            alt = _pick_row_tile(R, unit, max(1, R // 2))
            if alt != R:
                t_rows = alt
                in_blk = t_rows * row_bytes
                out_blk = t_rows * hw_p * itemsize
                need = 2 * (in_blk + out_blk)

        x_r = x3.reshape(R, g * hw_p)
        kernel = functools.partial(_mgp_rows_kernel, g=g, hw=hw_p)
        out_r = pl.pallas_call(
            kernel,
            out_shape=jax.ShapeDtypeStruct((R, hw_p), x.dtype),
            grid_spec=pltpu.PrefetchScalarGridSpec(
                num_scalar_prefetch=0,
                grid=(R // t_rows,),
                in_specs=[pl.BlockSpec((t_rows, g * hw_p), lambda ri: (ri, 0))],
                out_specs=pl.BlockSpec((t_rows, hw_p), lambda ri: (ri, 0)),
            ),
            compiler_params=pltpu.CompilerParams(
                dimension_semantics=("parallel",),
                vmem_limit_bytes=_vmem_limit(need, limit_cap),
            ),
        )(x_r)
    else:
        # ----- fallback: huge rows -> also tile the pixel (lane) axis -------
        if R % unit == 0:
            t_rows = unit
        elif R % 8 == 0:
            t_rows = 8
        else:
            t_rows = R  # full extent is always legal
        padded_g = -(-g // unit) * unit  # sublane padding of the g axis in VMEM
        bytes_per_lane = 2 * t_rows * (padded_g + 1) * itemsize
        cap_lanes = min(
            max(1, budget // bytes_per_lane),
            max(1, target_block_bytes // (t_rows * padded_g * itemsize)),
        )
        t_hw = _largest_lane_tile(hw_p, cap_lanes)
        in_blk = t_rows * padded_g * t_hw * itemsize
        out_blk = t_rows * t_hw * itemsize
        need = 2 * (in_blk + out_blk)
        if need > budget:
            # Even the minimal legal block does not fit; stay correct.
            return jnp.max(x.reshape(b, cpg, g, h, w), axis=2)

        kernel = functools.partial(_mgp_hw_tiled_kernel, g=g)
        out_r = pl.pallas_call(
            kernel,
            out_shape=jax.ShapeDtypeStruct((R, hw_p), x.dtype),
            grid_spec=pltpu.PrefetchScalarGridSpec(
                num_scalar_prefetch=0,
                grid=(R // t_rows, hw_p // t_hw),
                in_specs=[pl.BlockSpec((t_rows, g, t_hw),
                                       lambda ri, hi: (ri, 0, hi))],
                out_specs=pl.BlockSpec((t_rows, t_hw),
                                       lambda ri, hi: (ri, hi)),
            ),
            compiler_params=pltpu.CompilerParams(
                dimension_semantics=("parallel", "parallel"),
                vmem_limit_bytes=_vmem_limit(need, limit_cap),
            ),
        )(x3)

    out = out_r[:, :hw] if hw_p != hw else out_r
    return out.reshape(b, cpg, h, w)


def max_group_pooling_ref(x: jax.Array, channel_per_group: int) -> jax.Array:
    """Pure-JAX reference mirroring the PyTorch forward."""
    if channel_per_group == 1:
        return x
    b, c, h, w = x.shape
    y = x.reshape(b, c // channel_per_group, channel_per_group, h, w)
    return jnp.max(y, axis=2)


def _check(x, g, **kwargs):
    out = jax.block_until_ready(max_group_pooling(x, g, min_pallas_bytes=0, **kwargs))
    ref = max_group_pooling_ref(x, g)
    np.testing.assert_array_equal(
        np.asarray(out, dtype=np.float32), np.asarray(ref, dtype=np.float32)
    )


if __name__ == "__main__":
    key = jax.random.PRNGKey(0)
    k1, k2, k3 = jax.random.split(key, 3)

    # 1) Main path, f32, hw already a multiple of 128.
    x1 = jax.random.normal(k1, (2, 4, 16, 16), dtype=jnp.float32)
    _check(x1, 2)

    # 2) Main path, bf16 (dtype-aware sublane unit) with hw padding (144 -> 256).
    x2 = jax.random.normal(k2, (2, 8, 12, 12), dtype=jnp.bfloat16)
    _check(x2, 2)

    # 3) hw-tiled fallback path (tiny forced block target) + group size 4.
    x3 = jax.random.normal(k3, (2, 8, 16, 16), dtype=jnp.float32)
    _check(x3, 2, target_block_bytes=1024)
    _check(x3, 4)

    # 4) channel_per_group == 1 passthrough.
    np.testing.assert_array_equal(np.asarray(max_group_pooling(x1, 1)),
                                  np.asarray(x1))

    print("KERNEL_OK")
</pallas_src>

<mosaic_0001>
module attributes {stable_mosaic.version = 11 : i64} {
  func.func @_mgp_rows_kernel(%arg0: i32, %arg1: memref<4x512xf32, #tpu.memory_space<vmem>>, %arg2: memref<4x256xf32, #tpu.memory_space<vmem>>) attributes {dimension_semantics = [#tpu.dimension_semantics<parallel>], iteration_bounds = array<i64: 1>, scalar_prefetch = 0 : i64, scratch_operands = 0 : i64, tpu.core_type = #tpu.core_type<tc>, window_params = [{transform_indices = @transform_0, window_bounds = array<i64: 4, 512>}, {transform_indices = @transform_1, window_bounds = array<i64: 4, 256>}]} {
    %c0 = arith.constant 0 : index
    %c0_0 = arith.constant 0 : index
    %0 = vector.load %arg1[%c0, %c0_0] : memref<4x512xf32, #tpu.memory_space<vmem>>, vector<4x256xf32>
    %c0_1 = arith.constant 0 : index
    %c256 = arith.constant 256 : index
    %1 = vector.load %arg1[%c0_1, %c256] : memref<4x512xf32, #tpu.memory_space<vmem>>, vector<4x256xf32>
    %2 = arith.maximumf %0, %1 : vector<4x256xf32>
    %c0_2 = arith.constant 0 : index
    %c0_3 = arith.constant 0 : index
    %3 = vector.load %arg2[%c0_2, %c0_3] : memref<4x256xf32, #tpu.memory_space<vmem>>, vector<4x256xf32>
    tpu.vector_store %arg2[%c0_2, %c0_3], %2 {strides = array<i32>} : memref<4x256xf32, #tpu.memory_space<vmem>>, vector<4x256xf32>,
    return
  }
  func.func @transform_0(%arg0: i32) -> (i32, i32) {
    %c0_i32 = arith.constant 0 : i32
    %c0_i32_0 = arith.constant 0 : i32
    return %arg0, %c0_i32 : i32, i32
  }
  func.func @transform_1(%arg0: i32) -> (i32, i32) {
    %c0_i32 = arith.constant 0 : i32
    %c0_i32_0 = arith.constant 0 : i32
    return %arg0, %c0_i32 : i32, i32
  }
}

</mosaic_0001>

<bundles_post_ra>
// kernel: tpu_custom_call.1
= control target key start
LH: loop header
LB: loop body
LE: loop exit
PB: predicated region body
PF: predicated region fallthrough
CT: control target
= control target key end

     0   :  { %6 = vsyncpa [#allocation3], 0  ;;  %s126_s0 = inlined_call_operand.hbm [shape: f32[4,512], index: 0, kind: input, shape index: {}]   ;;  %s127_s1 = inlined_call_operand.hbm [shape: f32[4,256], index: 1, kind: output, shape index: {}]  }
   0x1   :  { %7 = vsyncpa [#allocation4], 0  ;;  %s90_s6 = smov [#allocation2]   ;;  %s42_s10 = scalar_lea.hbm %s126_s0, 256 }
   0x2   :  { %s14_s7 = sshll.u32 %s90_s6, 4  ;;  %p43_p0 = scmp.ne.s32.totalorder %s126_s0, %s42_s10  ;;  %s15_s7 = int_to_ptr.vmem [resolvable:$true] %s14_s7 }
   0x3   :  { %p46_p1 = scmp.lt.u32.totalorder %s42_s10, %s126_s0 }
   0x5   :  { %p48_p2 = pnand %p46_p1, %p43_p0 }
   0x7   :  { %51 = shalt.err (!%p48_p2)
}
   0x8   :  { %s52_s15 = scalar_lea.vmem %s15_s7, 256  ;;  %p57_p4 = scmp.lt.s32.totalorder %s15_s7, %s15_s7 }
   0x9   :  { %p53_p3 = scmp.ne.s32.totalorder %s15_s7, %s52_s15  ;;  %p58_p5 = scmp.lt.s32.totalorder %s52_s15, %s52_s15 }
   0xb   :  { %p59_p6 = por %p58_p5, %p57_p4 }
   0xd   :  { %p60_p7 = pnand %p59_p6, %p53_p3 }
   0xf   :  { %63 = shalt.err (!%p60_p7)
}
  0x10   :  { %17 = dma.hbm_to_vmem [thread:$0]  %s126_s0, 256, %s15_s7, [#allocation3]  }
  0x11   :  { %86 = dma.done.wait [#allocation3], 256  }
  0x12   :  { %87 = vsyncadd [#allocation3], 4294967040  ;;  %s91_s18 = smov [#allocation5]   ;;  %v21_v0 = vld [vmem:[#allocation2] sm:$0xff]  ;;  %v22_v1 = vld [vmem:[#allocation2 + $0x8] sm:$0xff] }
  0x13   :  { %s31_s19 = sshll.u32 %s91_s18, 4  ;;  %v23_v2 = vmax.f32 %v21_v0, %v22_v1  ;;  %s32_s19 = int_to_ptr.vmem [resolvable:$true] %s31_s19 }
  0x14   :  { %s64_s20 = scalar_lea.vmem %s32_s19, 128  ;;  %p69_p9 = scmp.lt.s32.totalorder %s32_s19, %s32_s19 }
  0x15   :  { %24 = vst [vmem:[#allocation5] sm:$0xff] %v23_v2  ;;  %p65_p8 = scmp.ne.s32.totalorder %s32_s19, %s64_s20  ;;  %p70_p10 = scmp.lt.s32.totalorder %s64_s20, %s64_s20 }
  0x17   :  { %p71_p11 = por %p70_p10, %p69_p9 }
  0x19   :  { %p72_p12 = pnand %p71_p11, %p65_p8 }
  0x1b   :  { %75 = shalt.err (!%p72_p12)
}
  0x1c   :  { %s76_s0 = scalar_lea.hbm %s127_s1, 128 }
  0x1d   :  { %p77_p13 = scmp.ne.s32.totalorder %s127_s1, %s76_s0  ;;  %p80_p0 = scmp.lt.u32.totalorder %s76_s0, %s127_s1 }
  0x1f   :  { %p82_p1 = pnand %p80_p0, %p77_p13 }
  0x21   :  { %85 = shalt.err (!%p82_p1)
}
  0x22   :  { %34 = dma.vmem_to_hbm [thread:$0]  %s32_s19, 128, %s127_s1, [#allocation4]  }
  0x23   :  { %88 = dma.done.wait [#allocation4], 128  }
  0x24   :  { %89 = vsyncadd [#allocation4], 4294967168 }
  0x25   :  { %38 = vsyncpa [#allocation3], 1 }
  0x26   :  { %39 = vsyncpa [#allocation4], 1 }

</bundles_post_ra>
